<compile_context>
chip_gen: v5e
topology: v5e:2x2
jax: 0.10.0
libtpu: 0.0.40
codegen_flags: <defaults>
</compile_context>

<pallas_src>
import functools

import jax
import jax.numpy as jnp
from jax.experimental import pallas as pl
from jax.experimental.pallas import tpu as pltpu

NUM_NEG = 1  # module default

# 2-way "parallel" grid axis: shards the row stream across both TensorCores on
# dual-TC parts (v7x); on single-TC parts (v5e/v6e) it just runs serially.
# TODO(synk): gate on pltpu.get_tpu_info() once the TensorCore count is exposed.
_CORE_SPLIT = 2

# ~2 MiB of native-dtype input per pipeline buffer per step (>=1 MiB already
# sits at ~85% of the HBM roofline; 2 MiB keeps per-step overhead <10%).
_TARGET_IN_BYTES = 2 * 1024 * 1024
# Cap the f32 compute tile so in-kernel temporaries stay well inside VMEM.
_MAX_F32_TILE_BYTES = 4 * 1024 * 1024


def _rank_hinge_kernel(y_pred_ref, y_true_ref, out_ref, *, num_neg):
    """Accumulate per-lane hinge sums for one (core, row-block) grid point."""
    i = pl.program_id(1)  # row-block index within this core's stream

    @pl.when(i == 0)
    def _init():
        out_ref[...] = jnp.zeros_like(out_ref)

    # Upcast AFTER the load so HBM traffic stays in the native (e.g. bf16) dtype.
    d = y_true_ref[...].astype(jnp.float32) - y_pred_ref[...].astype(jnp.float32)
    lane_w = d.shape[1]

    # For a positive score at lane c (c % (num_neg+1) == 0) its k-th negative
    # sits at lane c + k; pltpu.roll(d, lane_w - k) brings it to lane c
    # (jnp.roll semantics).  Non-positive lanes produce finite junk that the
    # wrapper masks out of the tiny per-lane partial sums.
    hinge = None
    for k in range(1, num_neg + 1):
        shifted = pltpu.roll(d, shift=lane_w - k, axis=1)
        term = jnp.maximum(d - shifted, 0.0)
        hinge = term if hinge is None else hinge + term

    # The resident per-core output block doubles as the accumulator: the axis-0
    # sum is plain vreg adds plus one tiny intra-vreg fold -- no lane reduction
    # and no scalar RMW chain across grid steps.
    out_ref[...] += jnp.sum(hinge, axis=0, keepdims=True)


def adaptive_rank_hinge_loss(y_pred, y_true, num_neg=NUM_NEG, block_rows=None):
    assert y_pred.shape == y_true.shape, "y_pred / y_true shape mismatch"
    assert y_pred.ndim == 2 and y_pred.shape[1] == 1, (
        "kernel assumes ranking scores of width 1 (F == 1), as in matchzoo")
    n = y_pred.shape[0]
    step = num_neg + 1
    assert n % step == 0, "rows must interleave (pos, neg_0..neg_{num_neg-1})"
    num_groups = n // step

    lane_w = 128 * step                       # whole groups live in lanes
    itemsize = jnp.dtype(y_pred.dtype).itemsize
    pack = max(8, 32 // itemsize)             # sublane packing: 8 f32, 16 bf16, 32 i8

    rows = pl.cdiv(n, lane_w)
    if block_rows is None:
        tm = _TARGET_IN_BYTES // (lane_w * itemsize)
        tm = min(tm, _MAX_F32_TILE_BYTES // (lane_w * 4))
    else:
        tm = block_rows
    tm = max(pack, (tm // pack) * pack)                               # packing-aligned
    tm = min(tm, pl.cdiv(pl.cdiv(rows, _CORE_SPLIT), pack) * pack)    # don't overshoot data

    blocks_per_core = pl.cdiv(pl.cdiv(rows, tm), _CORE_SPLIT)
    rows_padded = _CORE_SPLIT * blocks_per_core * tm
    total = rows_padded * lane_w

    # One zero pad handles both the lane remainder and the row-block remainder:
    # padded groups give relu(0 - 0) = 0 and the mean uses the true group count.
    yp = jnp.pad(y_pred.reshape(-1), (0, total - n)).reshape(rows_padded, lane_w)
    yt = jnp.pad(y_true.reshape(-1), (0, total - n)).reshape(rows_padded, lane_w)

    in_tile = tm * lane_w * itemsize
    f32_tile = tm * lane_w * 4
    vmem_limit = max(16 << 20, min(32 << 20, 4 * in_tile + 5 * f32_tile + (6 << 20)))

    cost = pl.CostEstimate(
        flops=total * (2 + 2 * num_neg),
        transcendentals=0,
        bytes_accessed=2 * total * itemsize + _CORE_SPLIT * lane_w * 4,
    )

    def in_map(c, i):
        return (c * blocks_per_core + i, 0)

    kernel = functools.partial(_rank_hinge_kernel, num_neg=num_neg)

    partials = pl.pallas_call(
        kernel,
        out_shape=jax.ShapeDtypeStruct((_CORE_SPLIT, 1, lane_w), jnp.float32),
        grid_spec=pltpu.PrefetchScalarGridSpec(
            num_scalar_prefetch=0,
            grid=(_CORE_SPLIT, blocks_per_core),
            in_specs=[
                pl.BlockSpec((tm, lane_w), in_map),
                pl.BlockSpec((tm, lane_w), in_map),
            ],
            # Leading (core) dim squeezed away: each core sees a resident
            # (1, lane_w) f32 block that it accumulates into.
            out_specs=pl.BlockSpec((None, 1, lane_w), lambda c, i: (c, 0, 0)),
        ),
        compiler_params=pltpu.CompilerParams(
            dimension_semantics=("parallel", "arbitrary"),
            vmem_limit_bytes=vmem_limit,
        ),
        cost_estimate=cost,
    )(yp, yt)

    # Tiny epilogue in plain XLA (a few KiB): merge per-core per-lane partial
    # sums, keep only positive lanes (lane % step == 0), mean over true groups.
    per_lane = jnp.sum(partials.reshape(_CORE_SPLIT, lane_w), axis=0)
    keep = (jnp.arange(lane_w) % step) == 0
    return jnp.sum(jnp.where(keep, per_lane, 0.0)) / num_groups


def _reference_loss(y_pred, y_true, num_neg=NUM_NEG):
    """Pure-JAX mirror of the PyTorch forward (computed in f32)."""
    step = num_neg + 1
    p_pos = y_pred[::step, :].astype(jnp.float32)
    t_pos = y_true[::step, :].astype(jnp.float32)
    p_neg = jnp.concatenate(
        [y_pred[k + 1::step, :] for k in range(num_neg)], -1).astype(jnp.float32)
    t_neg = jnp.concatenate(
        [y_true[k + 1::step, :] for k in range(num_neg)], -1).astype(jnp.float32)
    loss = (t_pos - t_neg) - (p_pos - p_neg)
    loss = jnp.maximum(loss, 0.0)
    return loss.sum(axis=-1).mean()


if __name__ == "__main__":
    key = jax.random.PRNGKey(0)

    def make_inputs(k, n, num_neg, dtype):
        k1, k2 = jax.random.split(k)
        step = num_neg + 1
        y_pred = jax.random.normal(k1, (n, 1), dtype=jnp.float32).astype(dtype)
        labels = jnp.tile(
            jnp.concatenate([jnp.ones((1, 1)), jnp.zeros((num_neg, 1))], axis=0),
            (n // step, 1))
        y_true = (labels + 0.01 * jax.random.normal(k2, (n, 1))).astype(dtype)
        return y_pred, y_true

    # (n, num_neg, dtype, block_rows)
    checks = [
        (4096, 1, jnp.float32, None),     # default tiling, grid (2, 1)
        (8192, 1, jnp.float32, 8),        # multiple blocks per core, exact tiling
        (2050, 1, jnp.float32, None),     # N not a multiple of lane width -> pad
        (768, 2, jnp.float32, None),      # num_neg > 1 (three-way groups)
        (16384, 1, jnp.bfloat16, 24),     # bf16, 16-row packing, multi-block
        (131072, 1, jnp.float32, None),   # larger default-path tile
    ]
    for n, num_neg, dtype, block_rows in checks:
        key, sub = jax.random.split(key)
        y_pred, y_true = make_inputs(sub, n, num_neg, dtype)
        got = adaptive_rank_hinge_loss(y_pred, y_true, num_neg=num_neg,
                                       block_rows=block_rows)
        got = jax.block_until_ready(got)
        want = _reference_loss(y_pred, y_true, num_neg=num_neg)
        assert jnp.allclose(got, want, rtol=1e-4, atol=1e-5), (
            n, num_neg, str(dtype), block_rows, float(got), float(want))

    print("KERNEL_OK")
</pallas_src>

<mosaic_0001>
module attributes {stable_mosaic.version = 11 : i64} {
  func.func @_rank_hinge_kernel(%arg0: i32, %arg1: i32, %arg2: memref<8x256xf32, #tpu.memory_space<vmem>>, %arg3: memref<8x256xf32, #tpu.memory_space<vmem>>, %arg4: memref<1x1x256xf32, #tpu.memory_space<vmem>>) attributes {dimension_semantics = [#tpu.dimension_semantics<parallel>, #tpu.dimension_semantics<arbitrary>], iteration_bounds = array<i64: 2, 1>, scalar_prefetch = 0 : i64, scratch_operands = 0 : i64, tpu.core_type = #tpu.core_type<tc>, window_params = [{transform_indices = @transform_0, window_bounds = array<i64: 8, 256>}, {transform_indices = @transform_1, window_bounds = array<i64: 8, 256>}, {transform_indices = @transform_2, window_bounds = array<i64: 1, 1, 256>}]} {
    %c0_i32 = arith.constant 0 : i32
    %0 = arith.cmpi eq, %arg1, %c0_i32 : i32
    %1 = arith.extui %0 : i1 to i32
    %c0_i32_0 = arith.constant 0 : i32
    %2 = arith.cmpi ne, %1, %c0_i32_0 : i32
    scf.if %2 {
      %cst_11 = arith.constant 0.000000e+00 : f32
      %18 = vector.broadcast %cst_11 : f32 to vector<1x256xf32>
      %c0_12 = arith.constant 0 : index
      %c0_13 = arith.constant 0 : index
      %c0_14 = arith.constant 0 : index
      %19 = vector.load %arg4[%c0_12, %c0_13, %c0_14] : memref<1x1x256xf32, #tpu.memory_space<vmem>>, vector<1x1x256xf32>
      %20 = vector.shape_cast %19 : vector<1x1x256xf32> to vector<1x256xf32>
      %21 = vector.shape_cast %18 : vector<1x256xf32> to vector<1x1x256xf32>
      tpu.vector_store %arg4[%c0_12, %c0_13, %c0_14], %21 {strides = array<i32>} : memref<1x1x256xf32, #tpu.memory_space<vmem>>, vector<1x1x256xf32>,
    } else {
    }
    %c0 = arith.constant 0 : index
    %c0_1 = arith.constant 0 : index
    %3 = vector.load %arg3[%c0, %c0_1] : memref<8x256xf32, #tpu.memory_space<vmem>>, vector<8x256xf32>
    %c0_2 = arith.constant 0 : index
    %c0_3 = arith.constant 0 : index
    %4 = vector.load %arg2[%c0_2, %c0_3] : memref<8x256xf32, #tpu.memory_space<vmem>>, vector<8x256xf32>
    %5 = arith.subf %3, %4 : vector<8x256xf32>
    %c255_i32 = arith.constant 255 : i32
    %6 = tpu.dynamic_rotate %5 by %c255_i32 dim 1 : vector<8x256xf32>, i32 -> vector<8x256xf32>
    %7 = arith.subf %5, %6 : vector<8x256xf32>
    %cst = arith.constant 0.000000e+00 : f32
    %8 = vector.broadcast %cst : f32 to vector<8x256xf32>
    %9 = arith.maximumf %7, %8 : vector<8x256xf32>
    %c0_4 = arith.constant 0 : index
    %c0_5 = arith.constant 0 : index
    %c0_6 = arith.constant 0 : index
    %10 = vector.load %arg4[%c0_4, %c0_5, %c0_6] : memref<1x1x256xf32, #tpu.memory_space<vmem>>, vector<1x1x256xf32>
    %11 = vector.shape_cast %10 : vector<1x1x256xf32> to vector<1x256xf32>
    %cst_7 = arith.constant dense<0.000000e+00> : vector<256xf32>
    %12 = vector.multi_reduction <add>, %9, %cst_7 [0] : vector<8x256xf32> to vector<256xf32>
    %13 = vector.shape_cast %12 : vector<256xf32> to vector<1x256xf32>
    %14 = arith.addf %11, %13 : vector<1x256xf32>
    %c0_8 = arith.constant 0 : index
    %c0_9 = arith.constant 0 : index
    %c0_10 = arith.constant 0 : index
    %15 = vector.load %arg4[%c0_8, %c0_9, %c0_10] : memref<1x1x256xf32, #tpu.memory_space<vmem>>, vector<1x1x256xf32>
    %16 = vector.shape_cast %15 : vector<1x1x256xf32> to vector<1x256xf32>
    %17 = vector.shape_cast %14 : vector<1x256xf32> to vector<1x1x256xf32>
    tpu.vector_store %arg4[%c0_8, %c0_9, %c0_10], %17 {strides = array<i32>} : memref<1x1x256xf32, #tpu.memory_space<vmem>>, vector<1x1x256xf32>,
    return
  }
  func.func @transform_0(%arg0: i32, %arg1: i32) -> (i32, i32) {
    %c1_i32 = arith.constant 1 : i32
    %0 = arith.muli %arg0, %c1_i32 : i32
    %1 = arith.addi %0, %arg1 : i32
    %c0_i32 = arith.constant 0 : i32
    %c0_i32_0 = arith.constant 0 : i32
    return %1, %c0_i32 : i32, i32
  }
  func.func @transform_1(%arg0: i32, %arg1: i32) -> (i32, i32) {
    %c1_i32 = arith.constant 1 : i32
    %0 = arith.muli %arg0, %c1_i32 : i32
    %1 = arith.addi %0, %arg1 : i32
    %c0_i32 = arith.constant 0 : i32
    %c0_i32_0 = arith.constant 0 : i32
    return %1, %c0_i32 : i32, i32
  }
  func.func @transform_2(%arg0: i32, %arg1: i32) -> (i32, i32, i32) {
    %c0_i32 = arith.constant 0 : i32
    %c0_i32_0 = arith.constant 0 : i32
    %c0_i32_1 = arith.constant 0 : i32
    return %arg0, %c0_i32, %c0_i32_0 : i32, i32, i32
  }
}

</mosaic_0001>

<bundles_post_ra>
// kernel: tpu_custom_call.1
= control target key start
LH: loop header
LB: loop body
LE: loop exit
PB: predicated region body
PF: predicated region fallthrough
CT: control target
= control target key end

     0   :  { %7 = vsyncpa [#allocation3], 0  ;;  %s791_s0 = inlined_call_operand.hbm [shape: f32[16,256], index: 0, kind: input, shape index: {}]   ;;  %s792_s1 = inlined_call_operand.hbm [shape: f32[16,256], index: 1, kind: input, shape index: {}]   ;;  %s793_s2 = inlined_call_operand.hbm [shape: f32[2,1,256], index: 2, kind: output, shape index: {}]  }
   0x1   :  { %9 = vsyncpa [#allocation3 + $0x1], 0 }
   0x2   :  { %10 = vsyncpa [#allocation6], 0 }
   0x3   :  { %12 = vsyncpa [#allocation6 + $0x1], 0 }
   0x4   :  { %13 = vsyncpa [#allocation4], 0 }
   0x5   :  { %15 = vsyncpa [#allocation4 + $0x1], 0  ;;  %s648_s9 = smov 0   ;;  %s650_s10 = smov 0  }
   0x6   :  { %s652_s11 = smov 0   ;;  %s654_s12 = smov 0  }
   0x7   :  { %s656_s13 = smov 0   ;;  %s658_s14 = smov 0  }
   0x8 LB: > { %s394_s15 = sadd.s32 4294967295, %s629_s14   ;;  %s395_s16 = sadd.s32 4294967294, %s629_s14   ;;  %s629_s14 = sphi %s658_s14, %s21_s14   ;;  %s625_s13 = sphi %s656_s13, %s804_s13   ;;  %s621_s12 = sphi %s654_s12, %s803_s12   ;;  %s617_s11 = sphi %s652_s11, %s802_s11   ;;  %s613_s10 = sphi %s650_s10, %s801_s10   ;;  %s609_s9 = sphi %s648_s9, %s800_s9  }
   0x9   : > { %s33_s17 = sadd.s32 1, %s625_s13  ;;  %s42_s18 = sadd.s32 1, %s617_s11 }
   0xa   : > { %p35_p0 = scmp.ge.s32.totalorder %s33_s17, 2  ;;  %p49_p1 = scmp.ne.s32.totalorder %s617_s11, %s613_s10 }
   0xb   : > { %p50_p2 = scmp.eq.s32.totalorder %s629_s14, 0  ;;  %p55_p3 = scmp.ne.s32.totalorder %s613_s10, %s609_s9 }
   0xc   : > { %s806_s17 = smov (%p35_p0, %s33_s17), 0  ;;  %p56_p5 = scmp.eq.s32.totalorder %s394_s15, 0 }
   0xd   : > { %p689_p4 = por %p50_p2, %p49_p1  ;;  %s39_s20 = ssub.s32 %s625_s13, %s806_s17 }
   0xe   : > { %p107_p6 = scmp.eq.s32.totalorder %s394_s15, 1  ;;  %p40_p7 = scmp.eq.s32.totalorder %s39_s20, 0 }
   0xf   : > { %p695_p8 = por %p56_p5, %p55_p3  ;;  %p113_p10 = scmp.eq.s32.totalorder %s395_s16, 1 }
  0x10   : > { %p699_p9 = por %p107_p6, %p49_p1  ;;  %p397_p12 = scmp.ge.s32.totalorder %s629_s14, 2 }
  0x11   : > { %s704_s23 = scalar_select %p40_p7, %s617_s11, %s42_s18  }
  0x12   : > { %p706_p11 = por %p113_p10, %p55_p3  ;;  %p431_p13 = scmp.lt.s32.totalorder %s629_s14, 2 }
  0x13   : > { %s133_s25 = sand.u32 1, %s617_s11   ;;  %s412_s27 = sshll.u32 %s625_s13, 4 }
  0x14   : > { %s398_s26 = sshll.u32 %s133_s25, 4  ;;  %s143_s30 = scalar_lea.hbm %s791_s0, %s412_s27 }
  0x15   : > { %s137_s3 = scalar_lea.vmem [#allocation2], %s398_s26  ;;  %s145_s5 = sshll.u32 %s143_s30, 4  ;;  %s146_s5 = int_to_ptr.hbm [resolvable:$true] %s145_s5 }
  0x16   : > { %s147_s4 = sshll.u32 %s137_s3, 4  ;;  %p421_p0 = pnand %p431_p13, %p689_p4  ;;  %s148_s4 = int_to_ptr.vmem [resolvable:$true] %s147_s4 }
  0x17   : > { %p404_p1 = scmp.ge.s32.totalorder %s629_s14, 1  ;;  %p173_p2 = scmp.lt.s32.totalorder %s629_s14, 3 }
  0x18   : > { %s134_s6 = scalar_lea.sflag [#allocation3], %s133_s25  ;;  %s164_s15 = scalar_lea.hbm %s792_s1, %s412_s27 }
  0x19   : > { %423 = dma.hbm_to_vmem [thread:$0]  (!%p421_p0), %s146_s5, 256, %s148_s4, %s134_s6  }
  0x1a   : > { %p174_p3 = pnand %p404_p1, %p173_p2  ;;  %s158_s16 = scalar_lea.vmem [#allocation5], %s398_s26 }
  0x1b   : > { %s168_s18 = sshll.u32 %s158_s16, 4  ;;  %s166_s20 = sshll.u32 %s164_s15, 4  ;;  %s169_s18 = int_to_ptr.vmem [resolvable:$true] %s168_s18  ;;  %s167_s20 = int_to_ptr.hbm [resolvable:$true] %s166_s20 }
  0x1c   : > { %s155_s28 = scalar_lea.sflag [#allocation6], %s133_s25  ;;  %177 = sbr.rel (%p174_p3) target bundleno = 188 (0xbc), region = 28 }
  0x1d   : > { %426 = dma.hbm_to_vmem [thread:$0]  (!%p421_p0), %s167_s20, 256, %s169_s18, %s155_s28  }
  0x1e   : > { %s725_s19 = sand.u32 (!%p174_p3), 1, %s613_s10  }
  0x1f   : > { %s405_s29 = sshll.u32 (!%p174_p3), %s725_s19, 4  ;;  %s180_s30 = scalar_lea.sflag (!%p174_p3), [#allocation3], %s725_s19 }
  0x20   : > { %s183_s3 = scalar_lea.vmem (!%p174_p3), [#allocation2], %s405_s29 }
  0x21   : > { %596 = dma.done.wait (%p695_p8), %s180_s30, 256  }
  0x22   : > { %598 = vsyncadd (%p695_p8), %s180_s30, 4294967040  ;;  %s190_s26 = scalar_lea.sflag [#allocation6], %s725_s19  ;;  %s193_s25 = scalar_lea.vmem [#allocation5], %s405_s29 }
  0x23   : > { %600 = dma.done.wait (%p695_p8), %s190_s26, 256  }
  0x24   : > { %602 = vsyncadd (%p695_p8), %s190_s26, 4294967040  ;;  %v231_v0 = vld [vmem:[%s193_s25] sm:$0xff]  ;;  %s631_s27 = smov 127   ;;  %v232_v3 = vld [vmem:[%s193_s25 + $0x8] sm:$0xff]  ;;  %s407_s4 = sshll.u32 %s725_s19, 1  ;;  %v226_v6 = vlaneseq  ;;  %v632_v8 = vmov 0.0  }
  0x25   : > { %v233_v1 = vld [vmem:[%s183_s3] sm:$0xff]  ;;  %v234_v4 = vld [vmem:[%s183_s3 + $0x8] sm:$0xff]  ;;  %s743_s5 = scalar_lea.vmem [#allocation7], %s407_s4  ;;  %s409_s21 = sshll.u32 %s621_s12, 1  ;;  %vm266_vm2 = vcmask 1040384  }
  0x26   : > { %v235_v2 = vsub.f32 %v231_v0, %v233_v1  ;;  %v236_v5 = vsub.f32 %v232_v3, %v234_v4  ;;  %vm739_vm0 = vcmp.lt.s32.totalorder %v226_v6, 256  ;;  %v242_v10 = vand.u32 127, %v226_v6  ;;  %s286_s8 = scalar_lea.hbm %s793_s2, %s409_s21  ;;  %s288_s15 = sshll.u32 %s743_s5, 4  ;;  %s289_s15 = int_to_ptr.vmem [resolvable:$true] %s288_s15 }
  0x27   : > { %230 = vst.msk [vmem:[%s743_s5] sm:$0x3] %vm739_vm0, %v632_v8  ;;  %s290_s16 = sshll.u32 %s286_s8, 4  ;;  %s276_s12 = scalar_lea.sflag [#allocation4], %s725_s19  ;;  %s291_s16 = int_to_ptr.hbm [resolvable:$true] %s290_s16 }
  0x28   : > { %237 = vrot.lane.b32.xlu0 %v235_v2, %s631_s27  ;;  %vm243_vm1 = vcmp.lt.s32.totalorder %v242_v10, 127  ;;  %s557_s18 = sshra.s32 %s291_s16, 4  ;;  %s563_s30 = scalar_lea.hbm %s793_s2, 4  ;;  %s558_s18 = int_to_ptr.hbm [resolvable:$true] %s557_s18 }
  0x29   : > { %s559_s20 = scalar_lea.hbm %s558_s18, 2  ;;  %p564_p7 = scmp.lt.s32.totalorder %s558_s18, %s793_s2 }
  0x2a   : > { %p560_p4 = scmp.ne.s32.totalorder %s558_s18, %s559_s20  ;;  %p565_p8 = scmp.lt.s32.totalorder %s563_s30, %s559_s20 }
  0x2c   : > { %p561_p5 = pnand %p560_p4, %p699_p9  ;;  %p566_p10 = por %p565_p8, %p564_p7 }
  0x2e   : > { %v250_v31 = vld [vmem:[%s743_s5] sm:$0x3]  ;;  %p562_p6 = pneg %p561_p5 }
  0x30   : > { %239 = vrot.lane.b32.xlu0 %v236_v5, %s631_s27  ;;  %p567_p13 = pnand %p566_p10, %p562_p6 }
  0x9a   : > { %v238_v9 = vpop.permute.xlu0 %237 }
  0xa2   : > { %v240_v11 = vpop.permute.xlu0 %239 }
  0xa3   : > { %v244_v12 = vsel %vm243_vm1, %v238_v9, %v240_v11  ;;  %v245_v13 = vsel %vm243_vm1, %v240_v11, %v238_v9 }
  0xa4   : > { %v246_v14 = vsub.f32 %v235_v2, %v244_v12  ;;  %v247_v15 = vsub.f32 %v236_v5, %v245_v13 }
  0xa6   : > { %v248_v16 = vmax.f32 %v246_v14, 0.0  ;;  %v249_v17 = vmax.f32 %v247_v15, 0.0 }
  0xa8   : > { %v251_v18 = vrot.slane %v248_v16, 4  ;;  %v257_v19 = vrot.slane %v249_v17, 4 }
  0xaa   : > { %v252_v20 = vadd.f32 %v251_v18, %v248_v16  ;;  %v258_v21 = vadd.f32 %v257_v19, %v249_v17 }
  0xac   : > { %v253_v22 = vrot.slane %v252_v20, 2  ;;  %v259_v23 = vrot.slane %v258_v21, 2 }
  0xae   : > { %v254_v24 = vadd.f32 %v253_v22, %v252_v20  ;;  %v260_v25 = vadd.f32 %v259_v23, %v258_v21 }
  0xb0   : > { %v255_v26 = vrot.slane %v254_v24, 1  ;;  %v261_v27 = vrot.slane %v260_v25, 1 }
  0xb2   : > { %v262_v28 = vadd.f32 %v261_v27, %v260_v25  ;;  %v256_v29 = vadd.f32 %v255_v26, %v254_v24 }
  0xb4   : > { %v265_v30 = vrot.slane %v262_v28, 7 }
  0xb6   : > { %v267_v32 = vsel %vm266_vm2, %v256_v29, %v265_v30 }
  0xb7   : > { %v269_v33 = vadd.f32 %v267_v32, %v250_v31 }
  0xb9   : > { %274 = vst.msk [vmem:[%s743_s5] sm:$0x3] %vm739_vm0, %v269_v33 }
  0xba   : > { %570 = shalt.err (!%p567_p13)
}
  0xbb   : > { %418 = dma.vmem_to_hbm [thread:$0]  (%p699_p9), %s289_s15, 32, %s291_s16, %s276_s12  }
  0xbc PF: > { %s302_s19 = sand.u32 1, %s609_s9   ;;  %p428_p0 = pnand %p397_p12, %p706_p11 }
  0xbd   : > { %s303_s25 = scalar_lea.sflag [#allocation4], %s302_s19 }
  0xbe   : > { %p429_p1 = pneg %p428_p0 }
  0xc0   : > { %604 = dma.done.wait (%p429_p1), %s303_s25, 32  }
  0xc1   : > { %606 = vsyncadd (%p429_p1), %s303_s25, 4294967264  ;;  %s21_s14 = sadd.s32 1, %s629_s14   ;;  %s800_s9 = smov %s613_s10 }
  0xc2   : > { %p18_p2 = scmp.ge.s32.totalorder %s21_s14, 4   ;;  %s801_s10 = smov %s617_s11 }
  0xc3   : > { %s802_s11 = smov %s704_s23  ;;  %s803_s12 = smov %s625_s13 }
  0xc4   : > { %s804_s13 = smov %s806_s17  ;;  %20 = sbr.rel (!%p18_p2) target bundleno = 8 (0x8), region = 90 }
  0xc9   :  { %309 = vsyncpa [#allocation3], 1 }
  0xca   :  { %311 = vsyncpa [#allocation3 + $0x1], 1 }
  0xcb   :  { %312 = vsyncpa [#allocation6], 1 }
  0xcc   :  { %314 = vsyncpa [#allocation6 + $0x1], 1 }
  0xcd   :  { %315 = vsyncpa [#allocation4], 1 }
  0xce   :  { %317 = vsyncpa [#allocation4 + $0x1], 1 }

</bundles_post_ra>
